<compile_context>
chip_gen: v5e
topology: v5e:2x2
jax: 0.10.0
libtpu: 0.0.40
codegen_flags: <defaults>
</compile_context>

<pallas_src>
import functools

import jax
import jax.numpy as jnp
from jax.experimental import pallas as pl
from jax.experimental.pallas import tpu as pltpu

EPS = 1e-8


# ----------------------------------------------------------------------------
# Kernel 1: fused channel-wise LayerNorm (cLN) + bottleneck 1x1 conv
# ----------------------------------------------------------------------------
def _cln_bottleneck_kernel(x_ref, gamma_ref, beta_ref, wb_ref, o_ref):
    y = x_ref[0]                                           # (N, K) f32
    n = y.shape[0]
    mean = jnp.sum(y, axis=0, keepdims=True) / n           # per time step
    yc = y - mean
    var = jnp.sum(yc * yc, axis=0, keepdims=True) / n      # centered variance
    yn = gamma_ref[...] * (yc * jax.lax.rsqrt(var + EPS)) + beta_ref[...]
    # bottleneck 1x1 conv on the MXU: bf16 operands, f32 accumulate
    o_ref[0] = jnp.dot(wb_ref[...], yn.astype(jnp.bfloat16),
                       preferred_element_type=jnp.float32).astype(o_ref.dtype)


def cln_bottleneck(x, gamma, beta, wb_bf16):
    M, N, K = x.shape
    Bc = wb_bf16.shape[0]
    return pl.pallas_call(
        _cln_bottleneck_kernel,
        out_shape=jax.ShapeDtypeStruct((M, Bc, K), x.dtype),
        grid=(M,),
        in_specs=[
            pl.BlockSpec((1, N, K), lambda i: (i, 0, 0)),
            pl.BlockSpec((N, 1), lambda i: (0, 0)),
            pl.BlockSpec((N, 1), lambda i: (0, 0)),
            pl.BlockSpec((Bc, N), lambda i: (0, 0)),
        ],
        out_specs=pl.BlockSpec((1, Bc, K), lambda i: (i, 0, 0)),
        compiler_params=pltpu.CompilerParams(dimension_semantics=("parallel",)),
    )(x, gamma, beta, wb_bf16)


# ----------------------------------------------------------------------------
# Kernel 2: ONE lane-dense matmul for every FiLM linear of every block
#           (M*C, D) @ (D, nblk*H*2) + bias, tiled over the output axis so the
#           weight DMA pipelines behind compute.
# ----------------------------------------------------------------------------
def _pick_lane_tile(total, align=128, max_tile=4096):
    """Largest multiple of `align` dividing `total` (<= max_tile); else whole."""
    if total % align != 0:
        return total
    best = align
    t = align
    while t <= min(total, max_tile):
        if total % t == 0:
            best = t
        t += align
    return best


def _film_linear_kernel(q_ref, w_ref, b_ref, o_ref):
    o_ref[...] = (jnp.dot(q_ref[...], w_ref[...],
                          preferred_element_type=jnp.float32) + b_ref[...])


def film_linear(q_bf16, w_bf16, bias):
    MC, D = q_bf16.shape
    H2 = w_bf16.shape[1]
    tn = _pick_lane_tile(H2)
    return pl.pallas_call(
        _film_linear_kernel,
        out_shape=jax.ShapeDtypeStruct((MC, H2), jnp.float32),
        grid=(H2 // tn,),
        in_specs=[
            pl.BlockSpec((MC, D), lambda j: (0, 0)),
            pl.BlockSpec((D, tn), lambda j: (0, j)),
            pl.BlockSpec((1, tn), lambda j: (0, j)),
        ],
        out_specs=pl.BlockSpec((MC, tn), lambda j: (0, j)),
        compiler_params=pltpu.CompilerParams(dimension_semantics=("parallel",)),
    )(q_bf16, w_bf16, bias)


# ----------------------------------------------------------------------------
# Kernel 3: the ENTIRE chain of Conditional_TemporalBlocks, fused.
#   grid = (M*C, nblk); the (B, K) activation stays resident in VMEM across
#   the (inner, 'arbitrary') block axis.  Per block:
#     conv1x1 -> PReLU -> gLN -> dilated depthwise conv -> FiLM (a*x+b)
#     -> PReLU -> gLN -> pointwise conv -> + residual
#   and at the last block: mask conv1x1 + ReLU epilogue (single HBM write).
# ----------------------------------------------------------------------------
def _chain_kernel(x_ref, ab_ref, w1_ref, g1g_ref, g1b_ref, dw_ref,
                  g2g_ref, g2b_ref, wp_ref, wm_ref, prelu_ref, dil_ref,
                  o_ref, act_ref, acc_ref, *, P, K, nblk, dil_values):
    j = pl.program_id(1)
    bf16 = jnp.bfloat16

    # first block: pull the bottleneck output into the resident VMEM activation
    @pl.when(j == 0)
    def _():
        act_ref[...] = x_ref[0]

    x = act_ref[...]                                    # (Bc, K) f32 residual

    # --- 1x1 conv (Bc -> H): bf16 operands on the MXU, f32 accumulate ---
    y = jnp.dot(w1_ref[0], x.astype(bf16), preferred_element_type=jnp.float32)

    # --- PReLU #1 (per-block scalar slope from SMEM) ---
    y = jnp.where(y >= 0, y, prelu_ref[j, 0] * y)

    # --- gLN #1: centered variance + rsqrt (EUP) ---
    inv_n = 1.0 / y.size
    mean = jnp.sum(y) * inv_n
    yc = y - mean
    var = jnp.sum(yc * yc) * inv_n
    y = g1g_ref[0] * (yc * jax.lax.rsqrt(var + EPS)) + g1b_ref[0]

    # --- dilated depthwise conv: XLU roll + edge masks (zero 'same' padding).
    # Dilation is data (SMEM); specialise the tap loop per *static* dilation
    # value behind pl.when so every roll shift / edge mask is static.
    t = jax.lax.broadcasted_iota(jnp.int32, (1, K), 1)
    dw = dw_ref[0]                                      # (H, P) f32
    center = (P - 1) // 2
    d_cur = dil_ref[j]
    for d_static in dil_values:
        @pl.when(d_cur == d_static)
        def _(d_static=d_static):
            pad = (P - 1) * d_static // 2
            acc = dw[:, center:center + 1] * y          # center tap (offset 0)
            for p in range(P):
                if p == center:
                    continue
                off = p * d_static - pad                # static tap offset
                tap = pltpu.roll(y, (-off) % K, 1)      # tap[:, t] == y[:, t+off]
                valid = jnp.logical_and(t + off >= 0, t + off < K)
                acc = acc + dw[:, p:p + 1] * jnp.where(valid, tap, 0.0)
            acc_ref[...] = acc

    # --- speaker-conditioned FiLM: a * conv + b ---
    ab = ab_ref[0, 0]                                   # (H, 2): [:,0]=a, [:,1]=b
    y = ab[:, 0:1] * acc_ref[...] + ab[:, 1:2]

    # --- PReLU #2 -> gLN #2 -> pointwise conv (H -> Bc) + residual ---
    y = jnp.where(y >= 0, y, prelu_ref[j, 1] * y)
    mean2 = jnp.sum(y) * inv_n
    yc2 = y - mean2
    var2 = jnp.sum(yc2 * yc2) * inv_n
    y = g2g_ref[0] * (yc2 * jax.lax.rsqrt(var2 + EPS)) + g2b_ref[0]
    out = jnp.dot(wp_ref[0], y.astype(bf16), preferred_element_type=jnp.float32) + x

    act_ref[...] = out                                  # stays resident in VMEM

    # last block: fused mask 1x1 conv + ReLU; single HBM write of the score
    @pl.when(j == nblk - 1)
    def _():
        score = jnp.dot(wm_ref[...], out.astype(bf16),
                        preferred_element_type=jnp.float32)
        o_ref[0] = jnp.maximum(score, 0.0).astype(o_ref.dtype)


def fused_temporal_chain(x, ab_all, prep, *, C):
    M, Bc, K = x.shape
    MC = ab_all.shape[0]
    nblk, H, P = prep['nblk'], prep['H'], prep['P']
    N = prep['mask_w_bf16'].shape[0]
    kern = functools.partial(_chain_kernel, P=P, K=K, nblk=nblk,
                             dil_values=prep['dilation_values'])
    return pl.pallas_call(
        kern,
        out_shape=jax.ShapeDtypeStruct((MC, N, K), jnp.float32),
        grid=(MC, nblk),
        in_specs=[
            pl.BlockSpec((1, Bc, K), lambda i, j: (i // C, 0, 0)),  # bottleneck out
            pl.BlockSpec((1, 1, H, 2), lambda i, j: (i, j, 0, 0)),  # FiLM (a, b)
            pl.BlockSpec((1, H, Bc), lambda i, j: (j, 0, 0)),       # w1 (bf16)
            pl.BlockSpec((1, H, 1), lambda i, j: (j, 0, 0)),        # gLN1 gamma
            pl.BlockSpec((1, H, 1), lambda i, j: (j, 0, 0)),        # gLN1 beta
            pl.BlockSpec((1, H, P), lambda i, j: (j, 0, 0)),        # depthwise weight
            pl.BlockSpec((1, H, 1), lambda i, j: (j, 0, 0)),        # gLN2 gamma
            pl.BlockSpec((1, H, 1), lambda i, j: (j, 0, 0)),        # gLN2 beta
            pl.BlockSpec((1, Bc, H), lambda i, j: (j, 0, 0)),       # pointwise (bf16)
            pl.BlockSpec((N, Bc), lambda i, j: (0, 0)),             # mask conv (bf16)
            pl.BlockSpec(memory_space=pltpu.MemorySpace.SMEM),      # PReLU slopes
            pl.BlockSpec(memory_space=pltpu.MemorySpace.SMEM),      # dilations
        ],
        out_specs=pl.BlockSpec((1, N, K), lambda i, j: (i, 0, 0)),
        scratch_shapes=[
            pltpu.VMEM((Bc, K), jnp.float32),   # resident activation / residual
            pltpu.VMEM((H, K), jnp.float32),    # depthwise conv accumulator
        ],
        compiler_params=pltpu.CompilerParams(
            dimension_semantics=("parallel", "arbitrary"),
            vmem_limit_bytes=32 * 1024 * 1024,
        ),
    )(x, ab_all, prep['w1_all'], prep['g1g_all'], prep['g1b_all'],
      prep['dw_all'], prep['g2g_all'], prep['g2b_all'], prep['wp_all'],
      prep['mask_w_bf16'], prep['prelu_all'], prep['dil_all'])


# ----------------------------------------------------------------------------
# One-time parameter packing (do at load time, NOT per forward call)
# ----------------------------------------------------------------------------
def prepare_params(params):
    blocks = params['blocks']
    nblk = len(blocks)
    H, Bc = blocks[0]['w1'].shape
    D = blocks[0]['wa'].shape[0]
    P = blocks[0]['dw'].shape[1]
    assert P % 2 == 1, "non-causal 'same' padding needs odd kernel size P"
    assert D == 512, "Conditional_DepthwiseSeparableConv hard-codes nn.Linear(512, H)"
    bf16 = jnp.bfloat16
    film_w = jnp.stack([jnp.stack([b['wa'], b['wb']], axis=-1) for b in blocks],
                       axis=1)                                 # (D, nblk, H, 2)
    film_b = jnp.stack([jnp.stack([b['ba'][0], b['bb'][0]], axis=-1)
                        for b in blocks], axis=0)              # (nblk, H, 2)
    return {
        'nblk': nblk, 'H': H, 'P': P,
        'ln_gamma': params['ln_gamma'],
        'ln_beta': params['ln_beta'],
        'bottleneck_w_bf16': params['bottleneck_w'].astype(bf16),
        'mask_w_bf16': params['mask_w'].astype(bf16),
        'w1_all': jnp.stack([b['w1'] for b in blocks]).astype(bf16),
        'wp_all': jnp.stack([b['wp'] for b in blocks]).astype(bf16),
        'dw_all': jnp.stack([b['dw'] for b in blocks]),
        'g1g_all': jnp.stack([b['g1_g'] for b in blocks]),
        'g1b_all': jnp.stack([b['g1_b'] for b in blocks]),
        'g2g_all': jnp.stack([b['g2_g'] for b in blocks]),
        'g2b_all': jnp.stack([b['g2_b'] for b in blocks]),
        'prelu_all': jnp.stack([b['prelu'] for b in blocks]),
        'dil_all': jnp.asarray([b['dilation'] for b in blocks], jnp.int32),
        'dilation_values': tuple(sorted({b['dilation'] for b in blocks})),
        'film_w_bf16': film_w.reshape(D, nblk * H * 2).astype(bf16),
        'film_b': film_b.reshape(1, nblk * H * 2),
    }


# ----------------------------------------------------------------------------
# TemporalConvNet forward (middle_separation_mode) -- glue in plain JAX
# ----------------------------------------------------------------------------
def temporal_conv_net_forward(prep, mixture_w, hidden_outputs):
    M, N, K = mixture_w.shape
    M2, C, D = hidden_outputs.shape
    assert M == M2
    assert prep['bottleneck_w_bf16'].shape[0] == N, \
        "middle_separation_mode requires B == N"

    # fused cLN + bottleneck 1x1 conv (single HBM round trip)
    x = cln_bottleneck(mixture_w, prep['ln_gamma'], prep['ln_beta'],
                       prep['bottleneck_w_bf16'])              # (M, B, K)

    # all 2*R*X FiLM linears as ONE tiled lane-dense matmul
    MC = M * C
    q = hidden_outputs.reshape(MC, D).astype(jnp.bfloat16)
    ab = film_linear(q, prep['film_w_bf16'], prep['film_b'])   # (MC, nblk*H*2)
    ab = ab.reshape(MC, prep['nblk'], prep['H'], 2)

    # whole temporal block chain + mask conv + ReLU in one pallas_call; the
    # speaker broadcast over C happens inside the index map (i // C), never
    # materialized in HBM.
    score = fused_temporal_chain(x, ab, prep, C=C)             # (MC, N, K)
    return score.reshape(M, C, N, K)


# ----------------------------------------------------------------------------
# Pure-JAX reference (matches the kernels' bf16-operand / f32-accumulate dots)
# ----------------------------------------------------------------------------
def _mm_bf16(w, x):
    return jnp.einsum('oi,mik->mok', w.astype(jnp.bfloat16),
                      x.astype(jnp.bfloat16),
                      preferred_element_type=jnp.float32)


def ref_forward(params, mixture_w, hidden_outputs, *, P):
    M, N, K = mixture_w.shape
    _, C, D = hidden_outputs.shape
    bf16 = jnp.bfloat16
    y = mixture_w
    mean = y.mean(axis=1, keepdims=True)
    var = ((y - mean) ** 2).mean(axis=1, keepdims=True)
    x = params['ln_gamma'][None] * (y - mean) / jnp.sqrt(var + EPS) + params['ln_beta'][None]
    x = _mm_bf16(params['bottleneck_w'], x)
    Bc = x.shape[1]
    x = jnp.broadcast_to(x[:, None], (M, C, Bc, K)).reshape(M * C, Bc, K)
    q = hidden_outputs.reshape(M * C, D)
    for blk in params['blocks']:
        res = x
        y = _mm_bf16(blk['w1'], x)
        y = jnp.where(y >= 0, y, blk['prelu'][0] * y)
        mean = y.mean(axis=(1, 2), keepdims=True)
        var = ((y - mean) ** 2).mean(axis=(1, 2), keepdims=True)
        y = blk['g1_g'][None] * (y - mean) / jnp.sqrt(var + EPS) + blk['g1_b'][None]
        d = blk['dilation']
        pad = (P - 1) * d // 2
        yp = jnp.pad(y, ((0, 0), (0, 0), (pad, pad)))
        acc = sum(blk['dw'][None, :, p:p + 1] * yp[:, :, p * d:p * d + K]
                  for p in range(P))
        a = jnp.dot(q.astype(bf16), blk['wa'].astype(bf16),
                    preferred_element_type=jnp.float32) + blk['ba']
        b = jnp.dot(q.astype(bf16), blk['wb'].astype(bf16),
                    preferred_element_type=jnp.float32) + blk['bb']
        y = a[:, :, None] * acc + b[:, :, None]
        y = jnp.where(y >= 0, y, blk['prelu'][1] * y)
        mean = y.mean(axis=(1, 2), keepdims=True)
        var = ((y - mean) ** 2).mean(axis=(1, 2), keepdims=True)
        y = blk['g2_g'][None] * (y - mean) / jnp.sqrt(var + EPS) + blk['g2_b'][None]
        y = _mm_bf16(blk['wp'], y)
        x = y + res
    score = jnp.maximum(_mm_bf16(params['mask_w'], x), 0.0)
    return score.reshape(M, C, N, K)


# ----------------------------------------------------------------------------
# Deterministic parameter initialization (shapes from the PyTorch __init__)
# ----------------------------------------------------------------------------
def init_params(key, *, N, Bc, H, P, X, R, D):
    ks = iter(jax.random.split(key, 128))

    def rnd(shape, scale=0.1):
        return (scale * jax.random.normal(next(ks), shape)).astype(jnp.float32)

    params = {
        'ln_gamma': jnp.ones((N, 1), jnp.float32),
        'ln_beta': jnp.zeros((N, 1), jnp.float32),
        'bottleneck_w': rnd((Bc, N)),     # Conv1d(N, B, 1)
        'mask_w': rnd((N, Bc)),           # Conv1d(B, N, 1)
        'blocks': [],
    }
    for _ in range(R):
        for xi in range(X):
            d = 2 ** xi
            params['blocks'].append({
                'dilation': d,
                'w1': rnd((H, Bc)),                              # Conv1d(B, H, 1)
                'prelu': jnp.full((2,), 0.25, jnp.float32),      # PReLU slopes 1&2
                'g1_g': jnp.ones((H, 1), jnp.float32),
                'g1_b': jnp.zeros((H, 1), jnp.float32),
                'dw': rnd((H, P)),                               # depthwise Conv1d
                'wa': rnd((D, H)),                               # Linear(512, H)^T
                'ba': rnd((1, H)),
                'wb': rnd((D, H)),
                'bb': rnd((1, H)),
                'g2_g': jnp.ones((H, 1), jnp.float32),
                'g2_b': jnp.zeros((H, 1), jnp.float32),
                'wp': rnd((Bc, H)),                              # Conv1d(H, B, 1)
            })
    return params


if __name__ == "__main__":
    # Small shapes consistent with the module (middle_separation_mode needs
    # B == N and speaker-embedding dim D == 512).
    M, C, K = 2, 2, 128
    N = Bc = 16
    H, P, X, R = 32, 3, 2, 2
    D = 512

    key = jax.random.PRNGKey(0)
    k1, k2, k3 = jax.random.split(key, 3)
    mixture_w = jax.random.normal(k1, (M, N, K), dtype=jnp.float32)
    hidden_outputs = jax.random.normal(k2, (M, C, D), dtype=jnp.float32)
    params = init_params(k3, N=N, Bc=Bc, H=H, P=P, X=X, R=R, D=D)
    prep = prepare_params(params)            # one-time weight packing / bf16 cast

    est_mask = temporal_conv_net_forward(prep, mixture_w, hidden_outputs)
    est_mask = jax.block_until_ready(est_mask)
    assert est_mask.shape == (M, C, N, K)

    ref = ref_forward(params, mixture_w, hidden_outputs, P=P)
    if not bool(jnp.allclose(est_mask, ref, atol=2e-2, rtol=2e-2)):
        raise AssertionError(
            "mismatch vs reference, max abs diff = %e"
            % float(jnp.max(jnp.abs(est_mask - ref))))

    print("KERNEL_OK")
</pallas_src>

<mosaic_0001>
module attributes {stable_mosaic.version = 11 : i64} {
  func.func @_cln_bottleneck_kernel(%arg0: i32, %arg1: memref<1x16x128xf32, #tpu.memory_space<vmem>>, %arg2: memref<16x1xf32, #tpu.memory_space<vmem>>, %arg3: memref<16x1xf32, #tpu.memory_space<vmem>>, %arg4: memref<16x16xbf16, #tpu.memory_space<vmem>>, %arg5: memref<1x16x128xf32, #tpu.memory_space<vmem>>) attributes {dimension_semantics = [#tpu.dimension_semantics<parallel>], iteration_bounds = array<i64: 2>, scalar_prefetch = 0 : i64, scratch_operands = 0 : i64, tpu.core_type = #tpu.core_type<tc>, window_params = [{transform_indices = @transform_0, window_bounds = array<i64: 1, 16, 128>}, {pipeline_mode = #tpu.pipeline_mode<synchronous>, transform_indices = @transform_1, window_bounds = array<i64: 16, 1>}, {pipeline_mode = #tpu.pipeline_mode<synchronous>, transform_indices = @transform_2, window_bounds = array<i64: 16, 1>}, {pipeline_mode = #tpu.pipeline_mode<synchronous>, transform_indices = @transform_3, window_bounds = array<i64: 16, 16>}, {transform_indices = @transform_4, window_bounds = array<i64: 1, 16, 128>}]} {
    %c0 = arith.constant 0 : index
    %c0_0 = arith.constant 0 : index
    %c0_1 = arith.constant 0 : index
    %0 = vector.load %arg1[%c0, %c0_0, %c0_1] : memref<1x16x128xf32, #tpu.memory_space<vmem>>, vector<1x16x128xf32>
    %1 = vector.shape_cast %0 : vector<1x16x128xf32> to vector<16x128xf32>
    %cst = arith.constant dense<0.000000e+00> : vector<128xf32>
    %2 = vector.multi_reduction <add>, %1, %cst [0] : vector<16x128xf32> to vector<128xf32>
    %3 = vector.shape_cast %2 : vector<128xf32> to vector<1x128xf32>
    %cst_2 = arith.constant 1.600000e+01 : f32
    %4 = vector.broadcast %cst_2 : f32 to vector<1x128xf32>
    %5 = arith.divf %3, %4 : vector<1x128xf32>
    %6 = vector.broadcast %5 : vector<1x128xf32> to vector<16x128xf32>
    %7 = arith.subf %1, %6 : vector<16x128xf32>
    %8 = arith.mulf %7, %7 : vector<16x128xf32>
    %cst_3 = arith.constant dense<0.000000e+00> : vector<128xf32>
    %9 = vector.multi_reduction <add>, %8, %cst_3 [0] : vector<16x128xf32> to vector<128xf32>
    %10 = vector.shape_cast %9 : vector<128xf32> to vector<1x128xf32>
    %cst_4 = arith.constant 1.600000e+01 : f32
    %11 = vector.broadcast %cst_4 : f32 to vector<1x128xf32>
    %12 = arith.divf %10, %11 : vector<1x128xf32>
    %c0_5 = arith.constant 0 : index
    %c0_6 = arith.constant 0 : index
    %13 = vector.load %arg2[%c0_5, %c0_6] : memref<16x1xf32, #tpu.memory_space<vmem>>, vector<16x1xf32>
    %cst_7 = arith.constant 9.99999993E-9 : f32
    %14 = vector.broadcast %cst_7 : f32 to vector<1x128xf32>
    %15 = arith.addf %12, %14 : vector<1x128xf32>
    %16 = math.rsqrt %15 : vector<1x128xf32>
    %17 = vector.broadcast %16 : vector<1x128xf32> to vector<16x128xf32>
    %18 = arith.mulf %7, %17 : vector<16x128xf32>
    %19 = vector.broadcast %13 : vector<16x1xf32> to vector<16x128xf32>
    %20 = arith.mulf %19, %18 : vector<16x128xf32>
    %c0_8 = arith.constant 0 : index
    %c0_9 = arith.constant 0 : index
    %21 = vector.load %arg3[%c0_8, %c0_9] : memref<16x1xf32, #tpu.memory_space<vmem>>, vector<16x1xf32>
    %22 = vector.broadcast %21 : vector<16x1xf32> to vector<16x128xf32>
    %23 = arith.addf %20, %22 : vector<16x128xf32>
    %c0_10 = arith.constant 0 : index
    %c0_11 = arith.constant 0 : index
    %24 = vector.load %arg4[%c0_10, %c0_11] : memref<16x16xbf16, #tpu.memory_space<vmem>>, vector<16x16xbf16>
    %25 = arith.truncf %23 : vector<16x128xf32> to vector<16x128xbf16>
    %cst_12 = arith.constant dense<0.000000e+00> : vector<16x128xf32>
    %26 = tpu.matmul %24, %25, %cst_12 {dimension_numbers = #tpu.dot_dimension_numbers<[1], [0], [0], [1], [0, 0, 1, 1], [], []>} : vector<16x16xbf16>, vector<16x128xbf16>, vector<16x128xf32> -> vector<16x128xf32>
    %c0_13 = arith.constant 0 : index
    %c0_14 = arith.constant 0 : index
    %c0_15 = arith.constant 0 : index
    %27 = vector.load %arg5[%c0_13, %c0_14, %c0_15] : memref<1x16x128xf32, #tpu.memory_space<vmem>>, vector<1x16x128xf32>
    %28 = vector.shape_cast %27 : vector<1x16x128xf32> to vector<16x128xf32>
    %29 = vector.shape_cast %26 : vector<16x128xf32> to vector<1x16x128xf32>
    tpu.vector_store %arg5[%c0_13, %c0_14, %c0_15], %29 {strides = array<i32>} : memref<1x16x128xf32, #tpu.memory_space<vmem>>, vector<1x16x128xf32>,
    return
  }
  func.func @transform_0(%arg0: i32) -> (i32, i32, i32) {
    %c0_i32 = arith.constant 0 : i32
    %c0_i32_0 = arith.constant 0 : i32
    %c0_i32_1 = arith.constant 0 : i32
    return %arg0, %c0_i32, %c0_i32_0 : i32, i32, i32
  }
  func.func @transform_1(%arg0: i32) -> (i32, i32) {
    %c0_i32 = arith.constant 0 : i32
    %c0_i32_0 = arith.constant 0 : i32
    %c0_i32_1 = arith.constant 0 : i32
    return %c0_i32, %c0_i32_0 : i32, i32
  }
  func.func @transform_2(%arg0: i32) -> (i32, i32) {
    %c0_i32 = arith.constant 0 : i32
    %c0_i32_0 = arith.constant 0 : i32
    %c0_i32_1 = arith.constant 0 : i32
    return %c0_i32, %c0_i32_0 : i32, i32
  }
  func.func @transform_3(%arg0: i32) -> (i32, i32) {
    %c0_i32 = arith.constant 0 : i32
    %c0_i32_0 = arith.constant 0 : i32
    %c0_i32_1 = arith.constant 0 : i32
    return %c0_i32, %c0_i32_0 : i32, i32
  }
  func.func @transform_4(%arg0: i32) -> (i32, i32, i32) {
    %c0_i32 = arith.constant 0 : i32
    %c0_i32_0 = arith.constant 0 : i32
    %c0_i32_1 = arith.constant 0 : i32
    return %arg0, %c0_i32, %c0_i32_0 : i32, i32, i32
  }
}

</mosaic_0001>

<bundles_post_ra>
// kernel: tpu_custom_call.1
= control target key start
LH: loop header
LB: loop body
LE: loop exit
PB: predicated region body
PF: predicated region fallthrough
CT: control target
= control target key end

     0   :  { %9 = vsyncpa [#allocation3], 0  ;;  %s723_s0 = inlined_call_operand.vmem [shape: f32[2,16,128], index: 0, kind: input, shape index: {}]   ;;  %s724_s1 = inlined_call_operand.vmem [shape: f32[16,1], index: 1, kind: input, shape index: {}]   ;;  %s725_s2 = inlined_call_operand.vmem [shape: f32[16,1], index: 2, kind: input, shape index: {}]   ;;  %s726_s3 = inlined_call_operand.hbm [shape: bf16[16,16], index: 3, kind: input, shape index: {}]   ;;  %s727_s4 = inlined_call_operand.hbm [shape: f32[2,16,128], index: 4, kind: output, shape index: {}]  }
   0x1   :  { %10 = vsyncpa [#allocation4], 0 }
   0x2   :  { %12 = vsyncpa [#allocation4 + $0x1], 0  ;;  %s616_s15 = smov 0   ;;  %s618_s16 = smov 0  }
   0x3   :  { %s620_s17 = smov 0   ;;  %s622_s18 = smov 0  }
   0x4 LB: > { %s637_s19 = sadd.s32 4294967295, %s582_s18   ;;  %s402_s20 = sadd.s32 4294967294, %s582_s18   ;;  %s582_s18 = sphi %s622_s18, %s733_s18   ;;  %s578_s17 = sphi %s620_s17, %s732_s17   ;;  %s574_s16 = sphi %s618_s16, %s731_s16   ;;  %s570_s15 = sphi %s616_s15, %s730_s15  }
   0x5   : > { %s641_s21 = sadd.s32 1, %s582_s18   ;;  %s114_s22 = sadd.s32 1, %s578_s17 }
   0x6   : > { %s111_s23 = ssub.s32 %s582_s18, %s641_s21  ;;  %p124_p0 = scmp.ne.s32.totalorder %s578_s17, %s574_s16 }
   0x7   : > { %p112_p1 = scmp.eq.s32.totalorder %s111_s23, 0  ;;  %p125_p2 = scmp.eq.s32.totalorder %s637_s19, 1 }
   0x8   : > { %p130_p3 = scmp.ne.s32.totalorder %s574_s16, %s570_s15  ;;  %p131_p4 = scmp.eq.s32.totalorder %s402_s20, 1 }
   0x9   : > { %s652_s24 = scalar_select %p112_p1, %s578_s17, %s114_s22  }
   0xa   : > { %p654_p5 = por %p125_p2, %p124_p0  ;;  %p658_p6 = por %p131_p4, %p130_p3 }
   0xb   : > { %p403_p7 = scmp.ge.s32.totalorder %s582_s18, 1  ;;  %p138_p8 = scmp.lt.s32.totalorder %s582_s18, 3 }
   0xc   : > { %p438_p9 = scmp.eq.s32.totalorder %s637_s19, 0  ;;  %s155_s29 = sshll.u32 %s726_s3, 4  ;;  %s156_s29 = int_to_ptr.hbm [resolvable:$true] %s155_s29 }
   0xd   : > { %p139_p10 = pnand %p403_p7, %p138_p8  ;;  %s584_s30 = smov [#allocation2]  }
   0xe   : > { %s157_s5 = sshll.u32 %s584_s30, 4  ;;  %s585_s6 = smov 64   ;;  %s158_s5 = int_to_ptr.vmem [resolvable:$true] %s157_s5 }
   0xf   : > { %p430_p11 = pneg %p139_p10  ;;  %s586_s7 = smov 4  }
  0x10   : > { %181 = sbr.rel (%p139_p10) target bundleno = 294 (0x126), region = 36 }
  0x11   : > { %p431_p12 = pnand %p438_p9, %p430_p11 }
  0x13   : > { %433 = dma.hbm_to_vmem [thread:$0]  (!%p431_p12), %s156_s29, 128, %s158_s5, [#allocation3], %s585_s6, %s585_s6, %s586_s7  }
  0x15   : > { %561 = dma.done.wait (%p438_p9), [#allocation3], 128  }
  0x16   : > { %563 = vsyncadd (%p438_p9), [#allocation3], 4294967168  ;;  %v587_v0 = vmov 0   ;;  %v270_v1 = vld [vmem:[%s725_s2] sm:$0xff]  ;;  %v271_v3 = vld [vmem:[%s725_s2 + $0x8] sm:$0xff]  ;;  %p208_p13 = scmp.lt.s32.totalorder %s637_s19, 1 }
  0x17   : > { %481 = vset.pattern.permute.xlu1 %v587_v0  ;;  %480 = vset.pattern.permute.xlu0 %v587_v0  ;;  %v243_v2 = vld [vmem:[%s724_s1] sm:$0xff]  ;;  %v244_v4 = vld [vmem:[%s724_s1 + $0x8] sm:$0xff]  ;;  %v588_v5 = vmov 16.0   ;;  %vm292_vm4 = vcmask 130048   ;;  %s205_s30 = sand.u32 1, %s574_s16   ;;  %s423_s6 = sshll.u32 %s637_s19, 4 }
  0x18   : > { %274 = vperm.xlu1 %481, %v270_v1   ;;  %260 = vperm.xlu0 %480, %v243_v2   ;;  %s209_s22 = scalar_select %p208_p13, %s637_s19, 1  ;;  %482 = vrcp.f32 %v588_v5  ;;  %v422_v53 = vld [vmem:[#allocation2] sm:$0xff] }
  0x19   : > { %s408_s5 = sshll.u32 %s205_s30, 4  ;;  %s324_s9 = scalar_lea.hbm %s727_s4, %s423_s6 }
  0x1a   : > { %s421_s23 = sshll.u32 %s209_s22, 4  ;;  %s207_s10 = scalar_lea.vmem [#allocation5], %s408_s5 }
  0x1b   : > { %s212_s29 = scalar_lea.vmem %s723_s0, %s421_s23  ;;  %s325_s11 = sshll.u32 %s207_s10, 4  ;;  %s326_s11 = int_to_ptr.vmem [resolvable:$true] %s325_s11 }
  0x1c   : > { %v214_v6 = vld [vmem:[%s212_s29] sm:$0xff]  ;;  %v215_v7 = vld [vmem:[%s212_s29 + $0x8] sm:$0xff]  ;;  %s327_s12 = sshll.u32 %s324_s9, 4  ;;  %s313_s13 = scalar_lea.sflag [#allocation4], %s205_s30  ;;  %s328_s12 = int_to_ptr.hbm [resolvable:$true] %s327_s12 }
  0x1d   : > { %v216_v8 = vadd.f32 %v215_v7, %v214_v6  ;;  %s530_s14 = sshra.s32 %s328_s12, 4  ;;  %s536_s23 = scalar_lea.hbm %s727_s4, 32  ;;  %s531_s14 = int_to_ptr.hbm [resolvable:$true] %s530_s14 }
  0x1e   : > { %v483_v10 = vpop.eup %482  ;;  %s532_s20 = scalar_lea.hbm %s531_s14, 16  ;;  %p537_p3 = scmp.lt.s32.totalorder %s531_s14, %s727_s4 }
  0x1f   : > { %v217_v9 = vrot.slane %v216_v8, 4  ;;  %v224_v12 = vmul.f32 16.0, %v483_v10  ;;  %vm228_vm0 = vweird.f32 %v483_v10  ;;  %p533_p0 = scmp.ne.s32.totalorder %s531_s14, %s532_s20  ;;  %p538_p4 = scmp.lt.s32.totalorder %s536_s23, %s532_s20 }
  0x20   : > { %279 = vperm.xlu1 %481, %v271_v3   ;;  %265 = vperm.xlu0 %480, %v244_v4  }
  0x21   : > { %v218_v11 = vadd.f32 %v217_v9, %v216_v8  ;;  %v225_v14 = vsub.f32 1.0, %v224_v12  ;;  %p534_p1 = pnand %p533_p0, %p654_p5  ;;  %p539_p7 = por %p538_p4, %p537_p3 }
  0x23   : > { %v219_v13 = vrot.slane %v218_v11, 2  ;;  %v226_v16 = vmul.f32 %v483_v10, %v225_v14  ;;  %p535_p2 = pneg %p534_p1 }
  0x25   : > { %v220_v15 = vadd.f32 %v219_v13, %v218_v11  ;;  %v227_v18 = vadd.f32 %v483_v10, %v226_v16  ;;  %p540_p8 = pnand %p539_p7, %p535_p2 }
  0x27   : > { %v221_v17 = vrot.slane %v220_v15, 1  ;;  %v229_v20 = vsel %vm228_vm0, %v483_v10, %v227_v18 }
  0x29   : > { %v222_v19 = vadd.f32 %v221_v17, %v220_v15 }
  0x2b   : > { %v230_v21 = vmul.f32 %v229_v20, %v222_v19 }
  0x2d   : > { %v231_v22 = vsub.f32 %v214_v6, %v230_v21  ;;  %v232_v23 = vsub.f32 %v215_v7, %v230_v21 }
  0x2f   : > { %v233_v24 = vmul.f32 %v231_v22, %v231_v22  ;;  %v234_v25 = vmul.f32 %v232_v23, %v232_v23 }
  0x31   : > { %v235_v26 = vadd.f32 %v234_v25, %v233_v24 }
  0x33   : > { %v236_v27 = vrot.slane %v235_v26, 4 }
  0x35   : > { %v237_v28 = vadd.f32 %v236_v27, %v235_v26 }
  0x37   : > { %v238_v29 = vrot.slane %v237_v28, 2 }
  0x39   : > { %v239_v30 = vadd.f32 %v238_v29, %v237_v28 }
  0x3b   : > { %v240_v31 = vrot.slane %v239_v30, 1 }
  0x3d   : > { %v241_v32 = vadd.f32 %v240_v31, %v239_v30 }
  0x3f   : > { %v242_v33 = vmul.f32 %v241_v32, %v229_v20 }
  0x41   : > { %v245_v34 = vadd.f32 1e-08, %v242_v33 }
  0x43   : > { %484 = vrsqrt.f32 %v245_v34  ;;  %vm252_vm1 = vweird.f32 %v245_v34 }
  0x49   : > { %v485_v35 = vpop.eup %484 }
  0x4a   : > { %v247_v36 = vmul.f32 %v485_v35, %v245_v34  ;;  %vm253_vm2 = vweird.f32 %v485_v35 }
  0x4b   : > { %vm254_vm3 = vmor %vm252_vm1, %vm253_vm2 }
  0x4c   : > { %v248_v37 = vmul.f32 %v485_v35, %v247_v36 }
  0x4e   : > { %v249_v38 = vmul.f32 0.5, %v248_v37 }
  0x50   : > { %v250_v39 = vsub.f32 1.5, %v249_v38 }
  0x52   : > { %v251_v40 = vmul.f32 %v485_v35, %v250_v39 }
  0x54   : > { %v255_v43 = vsel %vm254_vm3, %v485_v35, %v251_v40 }
  0x55   : > { %v256_v44 = vmul.f32 %v255_v43, %v231_v22  ;;  %v257_v45 = vmul.f32 %v255_v43, %v232_v23 }
  0x8a   : > { %v275_v41 = vpop.permute.xlu1 %274  ;;  %v261_v42 = vpop.permute.xlu0 %260 }
  0x8b   : > { %v268_v46 = vmul.f32 %v261_v42, %v256_v44 }
  0x8d   : > { %v282_v50 = vadd.f32 %v275_v41, %v268_v46 }
  0x92   : > { %v266_v47 = vpop.permute.xlu0 %265  ;;  %v280_v49 = vpop.permute.xlu1 %279 }
  0x93   : > { %v269_v48 = vmul.f32 %v266_v47, %v257_v45 }
  0x95   : > { %v283_v51 = vadd.f32 %v280_v49, %v269_v48 }
  0x97   : > { %v286_v52 = vpack.c.bf16 %v283_v51, %v282_v50 }
  0x99   : > { %303 = vmatpush.bf16.msra.mxu0 %v286_v52 }
  0x9c   : > { %415 = vmatmul.msk.bf16.vlgmr.msra.gmra.mxu0 %vm292_vm4, %v422_v53 }
 0x119   : > { %v305_v54 = vpop.f32.mrf.mxu0 }
 0x11a   : > { %310 = vst [vmem:[%s207_s10] sm:$0xff] %v305_v54 }
 0x121   : > { %v307_v55 = vpop.f32.mrf.mxu0 }
 0x122   : > { %311 = vst [vmem:[%s207_s10 + $0x8] sm:$0xff] %v307_v55 }
 0x123   : > { %543 = shalt.err (!%p540_p8)
}
 0x124   : > { %s589_s29 = smov 128   ;;  %s590_s30 = smov 8  }
 0x125   : > { %428 = dma.vmem_to_hbm [thread:$0]  (%p654_p5), %s326_s11, 256, %s328_s12, %s313_s13, %s589_s29, %s589_s29, %s590_s30  }
 0x126 PF: > { %p440_p9 = scmp.ge.s32.totalorder %s582_s18, 2  ;;  %s342_s5 = sand.u32 1, %s570_s15  }
 0x127   : > { %s343_s6 = scalar_lea.sflag [#allocation4], %s342_s5 }
 0x128   : > { %p435_p10 = pnand %p440_p9, %p658_p6 }
 0x12a   : > { %p436_p11 = pneg %p435_p10 }
 0x12c   : > { %565 = dma.done.wait (%p436_p11), %s343_s6, 256  }
 0x12d   : > { %567 = vsyncadd (%p436_p11), %s343_s6, 4294967040  ;;  %p15_p12 = scmp.ge.s32.totalorder %s641_s21, 4   ;;  %s730_s15 = smov %s574_s16 }
 0x12e   : > { %s731_s16 = smov %s578_s17  ;;  %s732_s17 = smov %s652_s24 }
 0x12f   : > { %s733_s18 = smov %s641_s21  ;;  %17 = sbr.rel (!%p15_p12) target bundleno = 4 (0x4), region = 76 }
 0x134   :  { %349 = vsyncpa [#allocation3], 1 }
 0x135   :  { %351 = vsyncpa [#allocation3 + $0x1], 1 }
 0x136   :  { %352 = vsyncpa [#allocation4], 1 }
 0x137   :  { %354 = vsyncpa [#allocation4 + $0x1], 1 }

</bundles_post_ra>
